<compile_context>
chip_gen: v7x
topology: tpu7x:2x2x1
jax: 0.10.0
libtpu: 0.0.40
codegen_flags: <defaults>
</compile_context>

<pallas_src>
import functools

import jax
import jax.numpy as jnp
from jax.experimental import pallas as pl
from jax.experimental.pallas import tpu as pltpu

N_GLOBAL_ACTIONS = 2
N_HOSTS = 13
N_HOST_ACTIONS = 11
ACTION_SPACE = N_HOST_ACTIONS * N_HOSTS + N_GLOBAL_ACTIONS  # 145

HIDDEN1 = 256
HIDDEN2 = 64

IN_PAD_MULT = 128     # pad in_dim up to a multiple of 128 (lane-aligned K)
A_PAD = 256           # pad action space 145 -> 256 (lane-dense output slab)
NB_SUBLANE = 8        # pad batch (sublane) dim to 8 -> unmasked output stores


# ----------------------------------------------------------------------------
# Fused Pallas kernel: GCN1 -> GCN2 -> host-gather -> Linear + softmax
# ----------------------------------------------------------------------------
def _actor_fused_kernel(a_ref, x_ref, w1_ref, b1_ref, w2_ref, b2_ref,
                        sel_ref, w3_ref, b3_ref, o_ref):
    a = a_ref[...]                                                  # (N, N) bf16

    # --- GCN layer 1: relu(A @ X @ W1 + b1), left-associated (N << 256) ----
    ax = jnp.dot(a, x_ref[...], preferred_element_type=jnp.float32)  # (N, Fp)
    h1 = jnp.dot(ax.astype(jnp.bfloat16), w1_ref[...],
                 preferred_element_type=jnp.float32) + b1_ref[...]   # (N, 256)
    h1 = jnp.maximum(h1, 0.0)

    # --- GCN layer 2: relu(A @ (H1 @ W2) + b2) ------------------------------
    hw = jnp.dot(h1.astype(jnp.bfloat16), w2_ref[...],
                 preferred_element_type=jnp.float32)                 # (N, 64)
    h2 = jnp.dot(a, hw.astype(jnp.bfloat16),
                 preferred_element_type=jnp.float32) + b2_ref[...]
    h2 = jnp.maximum(h2, 0.0)                                        # (N, 64)
    h2b = h2.astype(jnp.bfloat16)

    # --- Actor head: host gather + Linear + softmax --------------------------
    # sel_ref: (13, nb_pad, N) one-hot (bf16-exact); sel[h, b] picks the h-th
    # host of graph b, so z[h, b, :] == host_z[b*13 + h, :].  One batched MXU
    # contraction replaces 13 serialized gather matmuls.
    sel = sel_ref[...]
    h2_rep = jnp.broadcast_to(h2b[None], (N_HOSTS,) + h2b.shape)     # (13, N, 64)
    z = jnp.einsum('hbn,hnd->hbd', sel, h2_rep,
                   preferred_element_type=jnp.float32)               # (13, nb, 64)

    # w3[h] holds rows [h*64:(h+1)*64] of the (832, A_PAD) output weight, so a
    # batched matmul over h followed by a sum over h reproduces
    # flat(nb, 832) @ W_out without any in-kernel reshape.  z is a 0/1
    # selection of bf16 values, so the bf16 cast below is exact.
    # TODO(synk): a single K=832 matmul against W_out(832, A_PAD) would fill
    # the v6e/v7x 256-deep MXU best, but needs an (nb, 832) repack reshape
    # Mosaic can reject; the batched contraction is the safe fallback.
    zt = jnp.einsum('hbd,hda->hba', z.astype(jnp.bfloat16), w3_ref[...],
                    preferred_element_type=jnp.float32)              # (13, nb, Ap)
    logits = jnp.sum(zt, axis=0) + b3_ref[...]                       # (nb, Ap)

    # Padded action columns carry bias -1e30 -> exp() == 0 -> softmax ignores
    # them.  Exact divide (not approx reciprocal): these probabilities feed
    # Categorical log-probs / policy gradients.
    m = jnp.max(logits, axis=-1, keepdims=True)
    e = jnp.exp(logits - m)
    o_ref[...] = (e / jnp.sum(e, axis=-1, keepdims=True)).astype(o_ref.dtype)


# ----------------------------------------------------------------------------
# Glue: normalized adjacency, parameter init, jitted forward
# ----------------------------------------------------------------------------
def normalized_adjacency(edge_index, num_nodes):
    # A_hat = D^{-1/2} (A + I) D^{-1/2}  (torch_geometric GCNConv default).
    # .add (not .set) so duplicate edges sum, matching GCNConv.
    src, dst = edge_index[0], edge_index[1]
    adj = jnp.zeros((num_nodes, num_nodes), jnp.float32).at[dst, src].add(1.0)
    adj = adj + jnp.eye(num_nodes, dtype=jnp.float32)
    deg = jnp.sum(adj, axis=1)
    dinv = 1.0 / jnp.sqrt(jnp.maximum(deg, 1.0))
    return adj * dinv[:, None] * dinv[None, :]


def init_params(key, in_dim, num_nodes=N_HOSTS, action_space=ACTION_SPACE,
                hidden1=HIDDEN1, hidden2=HIDDEN2):
    k1, k2, k3 = jax.random.split(key, 3)

    def glorot(k, fan_in, fan_out):
        lim = jnp.sqrt(6.0 / (fan_in + fan_out))
        return jax.random.uniform(k, (fan_in, fan_out), jnp.float32, -lim, lim)

    in_pad = IN_PAD_MULT * pl.cdiv(in_dim, IN_PAD_MULT)

    w1 = glorot(k1, in_dim, hidden1)
    w1 = jnp.pad(w1, ((0, in_pad - in_dim), (0, 0)))          # zero K-padding
    w2 = glorot(k2, hidden1, hidden2)

    w_out = glorot(k3, hidden2 * num_nodes, action_space)
    w_out = jnp.pad(w_out, ((0, 0), (0, A_PAD - action_space)))
    w3 = w_out.reshape(num_nodes, hidden2, A_PAD)             # (13, 64, 256)

    b_out = jnp.zeros((action_space,), jnp.float32)
    b3 = jnp.full((1, A_PAD), -1e30, jnp.float32).at[0, :action_space].set(b_out)

    return {
        "w1": w1.astype(jnp.bfloat16),                        # (in_pad, 256)
        "b1": jnp.zeros((1, hidden1), jnp.float32),
        "w2": w2.astype(jnp.bfloat16),                        # (256, 64)
        "b2": jnp.zeros((1, hidden2), jnp.float32),
        "w3": w3.astype(jnp.bfloat16),                        # (13, 64, 256)
        "b3": b3,                                             # (1, 256)
    }


@functools.partial(jax.jit, static_argnames=("nbatches",))
def actor_forward(params, x, a_hat, nbatches):
    """Full actor forward. `a_hat` is the precomputed normalized adjacency
    (hoisted out of the hot path); `nbatches` is static."""
    n, f = x.shape
    in_pad = params["w1"].shape[0]
    nb_pad = NB_SUBLANE * pl.cdiv(nbatches, NB_SUBLANE)

    # bf16 MXU-native operands prepared in the wrapper (fused by XLA; removes
    # per-call VPU cast work inside the kernel — matters most on v5e).
    x_pad = jnp.pad(x, ((0, 0), (0, in_pad - f))).astype(jnp.bfloat16)
    a_bf = a_hat.astype(jnp.bfloat16)

    # Static, jittable host selection (replaces eager jnp.nonzero gather):
    # sel3[h, b, j] = 1  iff node j is the (b*N_HOSTS + h)-th host overall,
    # i.e. exactly the row ordering of `x[hosts].reshape(nb, 13*64)` in torch.
    # One-hot values are exact in bf16.
    mask = x[:, 0] == 1.0
    rank = jnp.cumsum(mask.astype(jnp.int32)) - 1
    b_of = rank // N_HOSTS
    h_of = rank % N_HOSTS
    sel3 = (mask[None, None, :]
            & (b_of[None, None, :] == jnp.arange(nb_pad)[None, :, None])
            & (h_of[None, None, :] == jnp.arange(N_HOSTS)[:, None, None])
            ).astype(jnp.bfloat16)                             # (13, nb_pad, N)

    vmem = lambda: pl.BlockSpec(memory_space=pltpu.MemorySpace.VMEM)
    probs_pad = pl.pallas_call(
        _actor_fused_kernel,
        out_shape=jax.ShapeDtypeStruct((nb_pad, A_PAD), jnp.float32),
        in_specs=[vmem() for _ in range(9)],
        out_specs=vmem(),
        # Single resident tile; all live data (< 1 MiB) fits VMEM on every gen.
        # TODO(synk): on v7x add a "parallel" batch grid axis (2 TensorCores)
        # and exploit the block-diagonal structure of A_hat per graph once N
        # grows toward the 64 MiB VMEM limit; skip on v5e/v6e (pure overhead).
        # TODO(synk): in a per-step RL loop, keep the ~0.5 MB of weights
        # resident across calls (cross-call prefetch) to amortize weight DMA
        # and launch overhead, which dominate at these shapes.
    )(a_bf, x_pad, params["w1"], params["b1"], params["w2"], params["b2"],
      sel3, params["w3"], params["b3"])

    # Categorical(probs): we return the probability matrix; sample with
    # jax.random.categorical(key, jnp.log(probs)).
    return probs_pad[:nbatches, :ACTION_SPACE]


# ----------------------------------------------------------------------------
# Example run
# ----------------------------------------------------------------------------
if __name__ == "__main__":
    key = jax.random.PRNGKey(0)
    k_feat, k_param = jax.random.split(key)

    in_dim = 12
    nodes_per_graph = 16          # 13 hosts + 3 non-host nodes per graph
    nbatches = 2
    n_nodes = nodes_per_graph * nbatches  # 32

    # Node features: column 0 is the host indicator.
    feats = 0.1 * jax.random.normal(k_feat, (n_nodes, in_dim), jnp.float32)
    host_flag = jnp.zeros((n_nodes,), jnp.float32)
    for g in range(nbatches):
        base = g * nodes_per_graph
        host_flag = host_flag.at[base:base + N_HOSTS].set(1.0)
    x = feats.at[:, 0].set(host_flag)

    # Edges: undirected ring within each graph.
    src, dst = [], []
    for g in range(nbatches):
        base = g * nodes_per_graph
        for i in range(nodes_per_graph):
            a = base + i
            b = base + (i + 1) % nodes_per_graph
            src += [a, b]
            dst += [b, a]
    edge_index = jnp.array([src, dst], dtype=jnp.int32)   # (2, 64)

    # Hoisted: adjacency normalization happens once, not per forward call.
    a_hat = normalized_adjacency(edge_index, n_nodes)
    params = init_params(k_param, in_dim)

    probs = actor_forward(params, x, a_hat, nbatches=nbatches)
    probs = jax.block_until_ready(probs)

    assert probs.shape == (nbatches, ACTION_SPACE)
    assert bool(jnp.all(jnp.isfinite(probs)))
    assert bool(jnp.all(probs >= 0.0))
    # Exact softmax divide -> rows sum to 1 up to f32 rounding.
    assert bool(jnp.allclose(jnp.sum(probs, axis=-1), 1.0, atol=1e-4))

    print("KERNEL_OK")
</pallas_src>

<mosaic_0001>
module attributes {stable_mosaic.version = 11 : i64} {
  func.func @_actor_fused_kernel(%arg0: memref<32x32xbf16, #tpu.memory_space<vmem>>, %arg1: memref<32x128xbf16, #tpu.memory_space<vmem>>, %arg2: memref<128x256xbf16, #tpu.memory_space<vmem>>, %arg3: memref<1x256xf32, #tpu.memory_space<vmem>>, %arg4: memref<256x64xbf16, #tpu.memory_space<vmem>>, %arg5: memref<1x64xf32, #tpu.memory_space<vmem>>, %arg6: memref<13x8x32xbf16, #tpu.memory_space<vmem>>, %arg7: memref<13x64x256xbf16, #tpu.memory_space<vmem>>, %arg8: memref<1x256xf32, #tpu.memory_space<vmem>>, %arg9: memref<8x256xf32, #tpu.memory_space<vmem>>) attributes {dimension_semantics = [], scalar_prefetch = 0 : i64, scratch_operands = 0 : i64, tpu.core_type = #tpu.core_type<tc>} {
    %c0 = arith.constant 0 : index
    %c0_0 = arith.constant 0 : index
    %0 = vector.load %arg0[%c0, %c0_0] : memref<32x32xbf16, #tpu.memory_space<vmem>>, vector<32x32xbf16>
    %c0_1 = arith.constant 0 : index
    %c0_2 = arith.constant 0 : index
    %1 = vector.load %arg1[%c0_1, %c0_2] : memref<32x128xbf16, #tpu.memory_space<vmem>>, vector<32x128xbf16>
    %cst = arith.constant dense<0.000000e+00> : vector<32x128xf32>
    %2 = tpu.matmul %0, %1, %cst {dimension_numbers = #tpu.dot_dimension_numbers<[1], [0], [0], [1], [0, 0, 1, 1], [], []>} : vector<32x32xbf16>, vector<32x128xbf16>, vector<32x128xf32> -> vector<32x128xf32>
    %3 = arith.truncf %2 : vector<32x128xf32> to vector<32x128xbf16>
    %c0_3 = arith.constant 0 : index
    %c0_4 = arith.constant 0 : index
    %4 = vector.load %arg2[%c0_3, %c0_4] : memref<128x256xbf16, #tpu.memory_space<vmem>>, vector<128x256xbf16>
    %cst_5 = arith.constant dense<0.000000e+00> : vector<32x256xf32>
    %5 = tpu.matmul %3, %4, %cst_5 {dimension_numbers = #tpu.dot_dimension_numbers<[1], [0], [0], [1], [0, 0, 1, 1], [], []>} : vector<32x128xbf16>, vector<128x256xbf16>, vector<32x256xf32> -> vector<32x256xf32>
    %c0_6 = arith.constant 0 : index
    %c0_7 = arith.constant 0 : index
    %6 = vector.load %arg3[%c0_6, %c0_7] : memref<1x256xf32, #tpu.memory_space<vmem>>, vector<1x256xf32>
    %7 = vector.broadcast %6 : vector<1x256xf32> to vector<32x256xf32>
    %8 = arith.addf %5, %7 : vector<32x256xf32>
    %cst_8 = arith.constant 0.000000e+00 : f32
    %9 = vector.broadcast %cst_8 : f32 to vector<32x256xf32>
    %10 = arith.maximumf %8, %9 : vector<32x256xf32>
    %11 = arith.truncf %10 : vector<32x256xf32> to vector<32x256xbf16>
    %c0_9 = arith.constant 0 : index
    %c0_10 = arith.constant 0 : index
    %12 = vector.load %arg4[%c0_9, %c0_10] : memref<256x64xbf16, #tpu.memory_space<vmem>>, vector<256x64xbf16>
    %cst_11 = arith.constant dense<0.000000e+00> : vector<32x64xf32>
    %13 = tpu.matmul %11, %12, %cst_11 {dimension_numbers = #tpu.dot_dimension_numbers<[1], [0], [0], [1], [0, 0, 1, 1], [], []>} : vector<32x256xbf16>, vector<256x64xbf16>, vector<32x64xf32> -> vector<32x64xf32>
    %14 = arith.truncf %13 : vector<32x64xf32> to vector<32x64xbf16>
    %cst_12 = arith.constant dense<0.000000e+00> : vector<32x64xf32>
    %15 = tpu.matmul %0, %14, %cst_12 {dimension_numbers = #tpu.dot_dimension_numbers<[1], [0], [0], [1], [0, 0, 1, 1], [], []>} : vector<32x32xbf16>, vector<32x64xbf16>, vector<32x64xf32> -> vector<32x64xf32>
    %c0_13 = arith.constant 0 : index
    %c0_14 = arith.constant 0 : index
    %16 = vector.load %arg5[%c0_13, %c0_14] : memref<1x64xf32, #tpu.memory_space<vmem>>, vector<1x64xf32>
    %17 = vector.broadcast %16 : vector<1x64xf32> to vector<32x64xf32>
    %18 = arith.addf %15, %17 : vector<32x64xf32>
    %cst_15 = arith.constant 0.000000e+00 : f32
    %19 = vector.broadcast %cst_15 : f32 to vector<32x64xf32>
    %20 = arith.maximumf %18, %19 : vector<32x64xf32>
    %21 = arith.truncf %20 : vector<32x64xf32> to vector<32x64xbf16>
    %c0_16 = arith.constant 0 : index
    %c0_17 = arith.constant 0 : index
    %c0_18 = arith.constant 0 : index
    %22 = vector.load %arg6[%c0_16, %c0_17, %c0_18] : memref<13x8x32xbf16, #tpu.memory_space<vmem>>, vector<13x8x32xbf16>
    %23 = vector.shape_cast %21 : vector<32x64xbf16> to vector<1x32x64xbf16>
    %24 = vector.shape_cast %23 : vector<1x32x64xbf16> to vector<1x32x64xbf16>
    %25 = vector.broadcast %24 : vector<1x32x64xbf16> to vector<13x32x64xbf16>
    "tpu.trace_start"() <{level = 10 : i32, message = "hbn,hnd->hbd"}> : () -> ()
    %cst_19 = arith.constant dense<0.000000e+00> : vector<13x8x64xf32>
    %26 = tpu.matmul %22, %25, %cst_19 {dimension_numbers = #tpu.dot_dimension_numbers<[2], [1], [1], [2], [0, 0, 0, 1, 1, 2], [0], [0]>} : vector<13x8x32xbf16>, vector<13x32x64xbf16>, vector<13x8x64xf32> -> vector<13x8x64xf32>
    "tpu.trace_stop"() : () -> ()
    %27 = arith.truncf %26 : vector<13x8x64xf32> to vector<13x8x64xbf16>
    %c0_20 = arith.constant 0 : index
    %c0_21 = arith.constant 0 : index
    %c0_22 = arith.constant 0 : index
    %28 = vector.load %arg7[%c0_20, %c0_21, %c0_22] : memref<13x64x256xbf16, #tpu.memory_space<vmem>>, vector<13x64x256xbf16>
    "tpu.trace_start"() <{level = 10 : i32, message = "hbd,hda->hba"}> : () -> ()
    %cst_23 = arith.constant dense<0.000000e+00> : vector<13x8x256xf32>
    %29 = tpu.matmul %27, %28, %cst_23 {dimension_numbers = #tpu.dot_dimension_numbers<[2], [1], [1], [2], [0, 0, 0, 1, 1, 2], [0], [0]>} : vector<13x8x64xbf16>, vector<13x64x256xbf16>, vector<13x8x256xf32> -> vector<13x8x256xf32>
    "tpu.trace_stop"() : () -> ()
    %cst_24 = arith.constant dense<0.000000e+00> : vector<8x256xf32>
    %30 = vector.multi_reduction <add>, %29, %cst_24 [0] : vector<13x8x256xf32> to vector<8x256xf32>
    %c0_25 = arith.constant 0 : index
    %c0_26 = arith.constant 0 : index
    %31 = vector.load %arg8[%c0_25, %c0_26] : memref<1x256xf32, #tpu.memory_space<vmem>>, vector<1x256xf32>
    %32 = vector.broadcast %31 : vector<1x256xf32> to vector<8x256xf32>
    %33 = arith.addf %30, %32 : vector<8x256xf32>
    %cst_27 = arith.constant dense<0xFF800000> : vector<8xf32>
    %34 = vector.multi_reduction <maximumf>, %33, %cst_27 [1] : vector<8x256xf32> to vector<8xf32>
    %35 = vector.shape_cast %34 : vector<8xf32> to vector<8x1xf32>
    %36 = vector.broadcast %35 : vector<8x1xf32> to vector<8x256xf32>
    %37 = arith.subf %33, %36 : vector<8x256xf32>
    %38 = math.exp %37 : vector<8x256xf32>
    %cst_28 = arith.constant dense<0.000000e+00> : vector<8xf32>
    %39 = vector.multi_reduction <add>, %38, %cst_28 [1] : vector<8x256xf32> to vector<8xf32>
    %40 = vector.shape_cast %39 : vector<8xf32> to vector<8x1xf32>
    %41 = vector.broadcast %40 : vector<8x1xf32> to vector<8x256xf32>
    %42 = arith.divf %38, %41 : vector<8x256xf32>
    %c0_29 = arith.constant 0 : index
    %c0_30 = arith.constant 0 : index
    %43 = vector.load %arg9[%c0_29, %c0_30] : memref<8x256xf32, #tpu.memory_space<vmem>>, vector<8x256xf32>
    tpu.vector_store %arg9[%c0_29, %c0_30], %42 {strides = array<i32>} : memref<8x256xf32, #tpu.memory_space<vmem>>, vector<8x256xf32>,
    return
  }
}

</mosaic_0001>

<bundles_post_ra>
// kernel: actor_forward.1
= control target key start
LH: loop header
LB: loop body
LE: loop exit
PB: predicated region body
PF: predicated region fallthrough
CT: control target
= control target key end

     0   :  { %14 = vsyncpa [#allocation3], 0  ;;  %s2993_s30 = smov [#allocation2]   ;;  %s3406_s0 = inlined_call_operand.vmem [shape: bf16[32,32], index: 0, kind: input, shape index: {}]   ;;  %s3407_s1 = inlined_call_operand.vmem [shape: bf16[32,128], index: 1, kind: input, shape index: {}]   ;;  %s3408_s2 = inlined_call_operand.vmem [shape: bf16[128,256], index: 2, kind: input, shape index: {}]   ;;  %s3409_s3 = inlined_call_operand.vmem [shape: f32[1,256], index: 3, kind: input, shape index: {}]   ;;  %s3410_s4 = inlined_call_operand.vmem [shape: bf16[256,64], index: 4, kind: input, shape index: {}]   ;;  %s3411_s5 = inlined_call_operand.vmem [shape: f32[1,64], index: 5, kind: input, shape index: {}]   ;;  %s3412_s6 = inlined_call_operand.vmem [shape: bf16[13,8,32], index: 6, kind: input, shape index: {}]   ;;  %s3413_s7 = inlined_call_operand.hbm [shape: bf16[13,64,256], index: 7, kind: input, shape index: {}]   ;;  %s3414_s8 = inlined_call_operand.vmem [shape: f32[1,256], index: 8, kind: input, shape index: {}]   ;;  %s3415_s9 = inlined_call_operand.vmem [shape: f32[8,256], index: 9, kind: output, shape index: {}]  }
   0x1   :  { %s34_s10 = sshll.u32 %s2993_s30, 4  ;;  %s2969_s13 = scalar_lea.hbm %s3413_s7, 13312  ;;  %s35_s10 = int_to_ptr.vmem [resolvable:$true] %s34_s10 }
   0x2   :  { %p2970_p0 = scmp.ne.s32.totalorder %s3413_s7, %s2969_s13  ;;  %p2973_p1 = scmp.lt.u32.totalorder %s2969_s13, %s3413_s7 }
   0x4   :  { %p2975_p2 = pnand %p2973_p1, %p2970_p0 }
   0x6   :  { %2978 = shalt.err (!%p2975_p2)
}
   0x7   :  { %s2979_s18 = scalar_lea.vmem %s35_s10, 13312  ;;  %p2984_p4 = scmp.lt.s32.totalorder %s35_s10, %s35_s10 }
   0x8   :  { %p2980_p3 = scmp.ne.s32.totalorder %s35_s10, %s2979_s18  ;;  %p2985_p5 = scmp.lt.s32.totalorder %s2979_s18, %s2979_s18 }
   0xa   :  { %p2986_p6 = por %p2985_p5, %p2984_p4 }
   0xc   :  { %p2987_p7 = pnand %p2986_p6, %p2980_p3 }
   0xe   :  { %2990 = shalt.err (!%p2987_p7)
}
   0xf   :  { %s2994_s19 = smov 128   ;;  %s2995_s20 = smov 8  }
  0x10   :  { %40 = dma.hbm_to_vmem [thread:$0]  %s3413_s7, 13312, %s35_s10, [#allocation3], %s2994_s19, %s2994_s19, %s2995_s20  }
  0x11   :  { %2991 = dma.done.wait [#allocation3], 13312  }
  0x12   :  { %2992 = vsyncadd [#allocation3], 4294953984  ;;  %v2763_v0 = vld [vmem:[%s3407_s1] sm:$0xff]   ;;  %v2764_v1 = vld [vmem:[%s3407_s1 + $0x8] sm:$0xff]   ;;  %vm77_vm0 = vcmask 261120   ;;  %v2996_v20 = vmov 0   ;;  %v153_v43 = vlaneseq }
  0x13   :  { %2637 = vmatprep.subr.bf16.mxu0 %v2763_v0  ;;  %v3070_v2 = vld [vmem:[%s3406_s0] sm:$0xff]   ;;  %v3083_v5 = vld [vmem:[%s3406_s0 + $0x8] sm:$0xff]   ;;  %v2770_v6 = vld [vmem:[%s3408_s2 + $0x14] ss:$8 sps:$4 sm:$0xff]   ;;  %275 = vmatprep.mubr.bf16.mxu1 %v2996_v20  ;;  %vm2998_vm1 = vmmov 0   ;;  %vm1278_vm2 = vcmask 523264  }
  0x14   :  { %2638 = vmatpush3.bf16.msra.mxu0 %v2763_v0  ;;  %2641 = vmatprep.mubr.msk.bf16.mxu0 %vm77_vm0, %v3070_v2  ;;  %v2767_v3 = vld [vmem:[%s3408_s2 + $0x4] ss:$8 sps:$4 sm:$0xff]   ;;  %v2769_v4 = vld [vmem:[%s3408_s2] ss:$8 sps:$4 sm:$0xff]   ;;  %v2772_v7 = vld [vmem:[%s3408_s2 + $0x10] ss:$8 sps:$4 sm:$0xff]  }
  0x15   :  { %2639 = vmatprep.subr.bf16.mxu0 %v2764_v1  ;;  %243 = vmatprep.subr.bf16.mxu1 %v2767_v3  ;;  %v2773_v8 = vld [vmem:[%s3408_s2 + $0x24] ss:$8 sps:$4 sm:$0xff]   ;;  %v2775_v9 = vld [vmem:[%s3408_s2 + $0x20] ss:$8 sps:$4 sm:$0xff]   ;;  %v2776_v10 = vld [vmem:[%s3408_s2 + $0x34] ss:$8 sps:$4 sm:$0xff]  }
  0x16   :  { %244 = vmatpush1.bf16.msra.mxu1 %v2769_v4  ;;  %v2778_v11 = vld [vmem:[%s3408_s2 + $0x30] ss:$8 sps:$4 sm:$0xff]   ;;  %v2779_v12 = vld [vmem:[%s3408_s2 + $0x44] ss:$8 sps:$4 sm:$0xff]   ;;  %v2781_v13 = vld [vmem:[%s3408_s2 + $0x40] ss:$8 sps:$4 sm:$0xff]  }
  0x17   :  { %245 = vmatprep.subr.bf16.mxu1 %v2770_v6  ;;  %v2782_v14 = vld [vmem:[%s3408_s2 + $0x54] ss:$8 sps:$4 sm:$0xff]   ;;  %v2784_v15 = vld [vmem:[%s3408_s2 + $0x50] ss:$8 sps:$4 sm:$0xff]   ;;  %v2785_v16 = vld [vmem:[%s3408_s2 + $0x64] ss:$8 sps:$4 sm:$0xff]  }
  0x18   :  { %2640 = vmatpush3.bf16.msra.mxu0 %v2764_v1  ;;  %v2787_v17 = vld [vmem:[%s3408_s2 + $0x60] ss:$8 sps:$4 sm:$0xff]   ;;  %v2788_v18 = vld [vmem:[%s3408_s2 + $0x74] ss:$8 sps:$4 sm:$0xff]   ;;  %v2790_v19 = vld [vmem:[%s3408_s2 + $0x70] ss:$8 sps:$4 sm:$0xff]  }
  0x19   :  { %v2791_v21 = vld [vmem:[%s3410_s4 + $0x40] sm:$0xff]   ;;  %v2793_v23 = vld [vmem:[%s3410_s4 + $0x48] sm:$0xff]   ;;  %v2795_v25 = vld [vmem:[%s3410_s4 + $0x50] sm:$0xff]   ;;  %v3181_v44 = vshrl.u32 %v153_v43, 7 }
  0x1a   :  { %246 = vmatpush1.bf16.msra.mxu1 %v2772_v7  ;;  %v2792_v22 = vld [vmem:[%s3410_s4] sm:$0xff]   ;;  %2566 = vmatprep.subr.bf16.mxu0 %v2791_v21  ;;  %v2794_v24 = vld [vmem:[%s3410_s4 + $0x8] sm:$0xff]   ;;  %v2796_v26 = vld [vmem:[%s3410_s4 + $0x10] sm:$0xff]  }
  0x1b   :  { %2642 = vmatmul.mubr.msk.bf16.vlgmr.msra.gmra.mrb[0].mxu0 %vm77_vm0, %v3083_v5  ;;  %247 = vmatprep.subr.bf16.mxu1 %v2773_v8  ;;  %v2797_v27 = vld [vmem:[%s3410_s4 + $0x58] sm:$0xff]   ;;  %v2799_v29 = vld [vmem:[%s3410_s4 + $0x60] sm:$0xff]   ;;  %v2801_v31 = vld [vmem:[%s3410_s4 + $0x68] sm:$0xff]   ;;  %v155_v45 = vsub.s32 0, %v3181_v44  ;;  %v159_v47 = vsub.s32 1, %v3181_v44 }
  0x1c   :  { %2567 = vmatpush3.bf16.msra.mxu0 %v2792_v22  ;;  %v2798_v28 = vld [vmem:[%s3410_s4 + $0x18] sm:$0xff]   ;;  %v2800_v30 = vld [vmem:[%s3410_s4 + $0x20] sm:$0xff]   ;;  %v2802_v38 = vld [vmem:[%s3410_s4 + $0x28] sm:$0xff]  }
  0x1d   :  { %2568 = vmatprep.subr.bf16.mxu0 %v2793_v23  ;;  %v2803_v39 = vld [vmem:[%s3410_s4 + $0x70] sm:$0xff]   ;;  %v2805_v41 = vld [vmem:[%s3410_s4 + $0x78] sm:$0xff]   ;;  %v151_v46 = vld [vmem:[%s3409_s3] sm:$0x3] }
  0x1e   :  { %248 = vmatpush1.bf16.msra.mxu1 %v2775_v9  ;;  %v2804_v40 = vld [vmem:[%s3410_s4 + $0x30] sm:$0xff]   ;;  %v2806_v42 = vld [vmem:[%s3410_s4 + $0x38] sm:$0xff]   ;;  %v156_v48 = vrot.slane %v151_v46, %v155_v45  ;;  %v160_v49 = vrot.slane %v151_v46, %v159_v47 }
  0x1f   :  { %249 = vmatprep.subr.bf16.mxu1 %v2776_v10 }
  0x20   :  { %2569 = vmatpush3.bf16.msra.mxu0 %v2794_v24 }
  0x21   :  { %2570 = vmatprep.subr.bf16.mxu0 %v2795_v25 }
  0x22   :  { %250 = vmatpush1.bf16.msra.mxu1 %v2778_v11 }
  0x23   :  { %251 = vmatprep.subr.bf16.mxu1 %v2779_v12 }
  0x24   :  { %2571 = vmatpush3.bf16.msra.mxu0 %v2796_v26 }
  0x25   :  { %2572 = vmatprep.subr.bf16.mxu0 %v2797_v27 }
  0x26   :  { %252 = vmatpush1.bf16.msra.mxu1 %v2781_v13 }
  0x27   :  { %253 = vmatprep.subr.bf16.mxu1 %v2782_v14 }
  0x28   :  { %2573 = vmatpush3.bf16.msra.mxu0 %v2798_v28 }
  0x29   :  { %2574 = vmatprep.subr.bf16.mxu0 %v2799_v29 }
  0x2a   :  { %254 = vmatpush1.bf16.msra.mxu1 %v2784_v15 }
  0x2b   :  { %255 = vmatprep.subr.bf16.mxu1 %v2785_v16 }
  0x2c   :  { %2575 = vmatpush3.bf16.msra.mxu0 %v2800_v30  ;;  %v2997_v30 = vmov 0.0  }
  0x2d   :  { %2576 = vmatprep.subr.bf16.mxu0 %v2801_v31  ;;  %v2429_v31 = vld [vmem:[%s3411_s5] ss:$0 sm:$0xff] }
  0x2e   :  { %256 = vmatpush1.bf16.msra.mxu1 %v2787_v17 }
  0x2f   :  { %257 = vmatprep.subr.bf16.mxu1 %v2788_v18 }
  0x30   :  { %2577 = vmatpush3.bf16.msra.mxu0 %v2802_v38 }
  0x31   :  { %2578 = vmatprep.subr.bf16.mxu0 %v2803_v39 }
  0x32   :  { %258 = vmatpush1.bf16.msra.mxu1 %v2790_v19 }
  0x34   :  { %2579 = vmatpush3.bf16.msra.mxu0 %v2804_v40 }
  0x35   :  { %2580 = vmatprep.subr.bf16.mxu0 %v2805_v41 }
  0x38   :  { %2581 = vmatpush3.bf16.msra.mxu0 %v2806_v42 }
  0x39   :  { %2653 = vmatprep.subr.bf16.mxu0 %v2997_v30 }
  0xee   :  { %v2643_v32 = vpop.f32.mrb[0].mxu0 }
  0xef   :  { %v118_v33 = vpop.f32.mrb[1].mxu0 }
  0xf0   :  { %v2644_v34 = vpop.f32.mrb[2].mxu0 }
  0xf1   :  { %v134_v35 = vpack.c.bf16 %v2644_v34, %v2643_v32  ;;  %v121_v36 = vpop.f32.mrb[3].mxu0 }
  0xf2   :  { %v133_v37 = vpack.c.bf16 %v121_v36, %v118_v33 }
  0xf4   :  { %276 = vmatmul.mubr.bf16.vlgmr.msra.gmra.mrb[0].mxu1 %v133_v37 }
  0xf5   :  { %285 = vmatprep.mubr.bf16.mxu1 %v2996_v20 }
  0xfc   :  { %286 = vmatmul.mubr.bf16.gmra.mrb[4].mxu1 %v134_v35 }
  0xfd   :  { %2649 = vmatprep.mubr.msk.bf16.mxu1 %vm77_vm0, %v3070_v2 }
 0x1c7   :  { %v277_v50 = vpop.f32.mrb[0].mxu1 }
 0x1c8   :  { %v278_v51 = vadd.f32 %v277_v50, %v156_v48  ;;  %v279_v52 = vpop.f32.mrb[1].mxu1  ;;  %v551_v50 = vld [vmem:[%s3412_s6 + $0x8] sm:$0xf] }
 0x1c9   :  { %v280_v53 = vadd.f32 %v279_v52, %v160_v49  ;;  %v281_v54 = vpop.f32.mrb[2].mxu1  ;;  %v553_v52 = vld [vmem:[%s3412_s6 + $0x10] sm:$0xf] }
 0x1ca   :  { %v282_v55 = vadd.f32 %v281_v54, %v156_v48  ;;  %v283_v56 = vpop.f32.mrb[3].mxu1  ;;  %v296_v58 = vmax.f32 %v278_v51, 0.0  ;;  %v552_v51 = vld [vmem:[%s3412_s6 + $0xc] sm:$0xf]  ;;  %v555_v54 = vld [vmem:[%s3412_s6 + $0x18] sm:$0xf] }
 0x1cb   :  { %v284_v57 = vadd.f32 %v283_v56, %v160_v49  ;;  %v297_v60 = vmax.f32 %v280_v53, 0.0  ;;  %v554_v53 = vld [vmem:[%s3412_s6 + $0x14] sm:$0xf]  ;;  %v557_v56 = vld [vmem:[%s3412_s6 + $0x20] sm:$0xf] }
 0x1cc   :  { %v298_v59 = vmax.f32 %v282_v55, 0.0  ;;  %v556_v55 = vld [vmem:[%s3412_s6 + $0x1c] sm:$0xf] }
 0x1cd   :  { %v299_v61 = vmax.f32 %v284_v57, 0.0  ;;  %v558_v57 = vld [vmem:[%s3412_s6 + $0x24] sm:$0xf] }
 0x1ce   :  { %v304_v62 = vpack.c.bf16 %v298_v59, %v296_v58  ;;  %v2809_v58 = vld [vmem:[#allocation2 + $0x4] ss:$8 sps:$4 sm:$0xff]   ;;  %v559_v59 = vld [vmem:[%s3412_s6 + $0x28] sm:$0xf] }
 0x1cf   :  { %v305_v63 = vpack.c.bf16 %v299_v61, %v297_v60  ;;  %v287_v0 = vpop.f32.mrb[4].mxu1  ;;  %v560_v60 = vld [vmem:[%s3412_s6 + $0x2c] sm:$0xf]  ;;  %v2807_v61 = vld [vmem:[#allocation2] ss:$8 sps:$4 sm:$0xff]  }
 0x1d0   :  { %v288_v1 = vadd.f32 %v287_v0, %v156_v48  ;;  %v289_v2 = vpop.f32.mrb[5].mxu1  ;;  %v2813_v0 = vld [vmem:[#allocation2 + $0x10] ss:$8 sps:$4 sm:$0xff]  }
 0x1d1   :  { %v290_v3 = vadd.f32 %v289_v2, %v160_v49  ;;  %v291_v4 = vpop.f32.mrb[6].mxu1  ;;  %468 = vmatprep.mubr.bf16.mxu0 %v305_v63  ;;  %v2812_v63 = vld [vmem:[#allocation2 + $0x44] ss:$8 sps:$4 sm:$0xff]   ;;  %v561_v2 = vld [vmem:[%s3412_s6 + $0x30] sm:$0xf] }
 0x1d2   :  { %v292_v6 = vadd.f32 %v291_v4, %v156_v48  ;;  %v293_v7 = vpop.f32.mrb[7].mxu1  ;;  %469 = vmatmul.mubr.bf16.vlgmr.msra.gmra.mrb[4].mxu0 %v304_v62  ;;  %v300_v9 = vmax.f32 %v288_v1, 0.0  ;;  %v549_v48 = vld [vmem:[%s3412_s6] sm:$0xf]  ;;  %v2815_v62 = vld [vmem:[#allocation2 + $0x14] ss:$8 sps:$4 sm:$0xff]  }
 0x1d3   :  { %v294_v8 = vadd.f32 %v293_v7, %v160_v49  ;;  %v301_v11 = vmax.f32 %v290_v3, 0.0  ;;  %v550_v49 = vld [vmem:[%s3412_s6 + $0x4] sm:$0xf]  ;;  %v2810_v3 = vld [vmem:[#allocation2 + $0x40] ss:$8 sps:$4 sm:$0xff]  }
 0x1d4   :  { %v302_v10 = vmax.f32 %v292_v6, 0.0  ;;  %v2821_v1 = vld [vmem:[#allocation2 + $0x24] ss:$8 sps:$4 sm:$0xff]   ;;  %v2818_v4 = vld [vmem:[#allocation2 + $0x54] ss:$8 sps:$4 sm:$0xff]  }
 0x1d5   :  { %v303_v12 = vmax.f32 %v294_v8, 0.0  ;;  %v2819_v6 = vld [vmem:[#allocation2 + $0x20] ss:$8 sps:$4 sm:$0xff]   ;;  %v2827_v7 = vld [vmem:[#allocation2 + $0x34] ss:$8 sps:$4 sm:$0xff]  }
 0x1d6   :  { %v306_v13 = vpack.c.bf16 %v302_v10, %v300_v9  ;;  %v2816_v8 = vld [vmem:[#allocation2 + $0x50] ss:$8 sps:$4 sm:$0xff]   ;;  %v2824_v9 = vld [vmem:[#allocation2 + $0x64] ss:$8 sps:$4 sm:$0xff]  }
 0x1d7   :  { %v307_v14 = vpack.c.bf16 %v303_v12, %v301_v11  ;;  %v2825_v10 = vld [vmem:[#allocation2 + $0x30] ss:$8 sps:$4 sm:$0xff]   ;;  %v2822_v11 = vld [vmem:[#allocation2 + $0x60] ss:$8 sps:$4 sm:$0xff]   ;;  %v2830_v12 = vld [vmem:[#allocation2 + $0x74] ss:$8 sps:$4 sm:$0xff]  }
 0x1d9   :  { %476 = vmatprep.mubr.bf16.mxu0 %v307_v14  ;;  %v2833_v14 = vld [vmem:[#allocation2 + $0x84] ss:$8 sps:$4 sm:$0xff]  }
 0x1da   :  { %477 = vmatmul.mubr.bf16.gmra.mrb[8].mxu0 %v306_v13  ;;  %v2828_v13 = vld [vmem:[#allocation2 + $0x70] ss:$8 sps:$4 sm:$0xff]  }
 0x1db   :  { %2657 = vmatprep.mubr.msk.bf16.mxu0 %vm2998_vm1, %v2997_v30 }
 0x2a5   :  { %v2582_v15 = vpop.f32.mrb[4].mxu0 }
 0x2a6   :  { %v2583_v16 = vpop.f32.mrb[5].mxu0 }
 0x2a7   :  { %v2584_v17 = vadd.f32 %v2583_v16, %v2582_v15  ;;  %v2585_v18 = vpop.f32.mrb[6].mxu0  ;;  %v2836_v15 = vld [vmem:[#allocation2 + $0xc4] ss:$8 sps:$4 sm:$0xff]   ;;  %v2831_v16 = vld [vmem:[#allocation2 + $0x80] ss:$8 sps:$4 sm:$0xff]  }
 0x2a8   :  { %v2586_v19 = vpop.f32.mrb[7].mxu0 }
 0x2a9   :  { %v2587_v21 = vadd.f32 %v2586_v19, %v2585_v18  ;;  %v2834_v19 = vld [vmem:[#allocation2 + $0xc0] ss:$8 sps:$4 sm:$0xff]  }
 0x2ab   :  { %v485_v22 = vpack.c.bf16 %v2587_v21, %v2584_v17 }
 0x2ad   :  { %v2588_v23 = vpop.f32.mrb[8].mxu0  ;;  %2645 = vmatprep.subr.bf16.mxu1 %v485_v22 }
 0x2ae   :  { %v2589_v24 = vpop.f32.mrb[9].mxu0  ;;  %2646 = vmatpush3.bf16.msra.mxu1 %v485_v22 }
 0x2af   :  { %v2590_v25 = vadd.f32 %v2589_v24, %v2588_v23  ;;  %v2591_v26 = vpop.f32.mrb[10].mxu0  ;;  %v2839_v23 = vld [vmem:[#allocation2 + $0x94] ss:$8 sps:$4 sm:$0xff]  }
 0x2b0   :  { %v2592_v27 = vpop.f32.mrb[11].mxu0 }
 0x2b1   :  { %v2593_v28 = vadd.f32 %v2592_v27, %v2591_v26 }
 0x2b3   :  { %v486_v29 = vpack.c.bf16 %v2593_v28, %v2590_v25  ;;  %v2842_v25 = vld [vmem:[#allocation2 + $0xd4] ss:$8 sps:$4 sm:$0xff]  }
 0x2b5   :  { %2647 = vmatprep.subr.bf16.mxu1 %v486_v29 }
 0x2b6   :  { %2648 = vmatpush3.bf16.msra.mxu1 %v486_v29 }
 0x2b7   :  { %2661 = vmatprep.subr.bf16.mxu1 %v2997_v30 }
 0x2b9   :  { %2650 = vmatmul.mubr.msk.bf16.vlgmr.msra.gmra.mrb[8].mxu1 %vm77_vm0, %v3083_v5 }
 0x2ba   :  { %2665 = vmatprep.mubr.msk.bf16.mxu1 %vm2998_vm1, %v2997_v30 }
 0x38c   :  { %v2651_v32 = vpop.f32.mrb[8].mxu1 }
 0x38d   :  { %v537_v33 = vadd.f32 %v2651_v32, %v2429_v31  ;;  %v528_v34 = vpop.f32.mrb[9].mxu1  ;;  %v2840_v32 = vld [vmem:[#allocation2 + $0xd0] ss:$8 sps:$4 sm:$0xff]  }
 0x38e   :  { %v529_v5 = vadd.f32 %v2429_v31, %v528_v34  ;;  %v2652_v35 = vpop.f32.mrb[10].mxu1  ;;  %v2848_v34 = vld [vmem:[#allocation2 + $0xe4] ss:$8 sps:$4 sm:$0xff]  }
 0x38f   :  { %v540_v36 = vadd.f32 %v2652_v35, %v2429_v31  ;;  %v531_v37 = vpop.f32.mrb[11].mxu1  ;;  %v545_v39 = vmax.f32 %v537_v33, 0.0  ;;  %v2845_v33 = vld [vmem:[#allocation2 + $0xa4] ss:$8 sps:$4 sm:$0xff]   ;;  %v2846_v35 = vld [vmem:[#allocation2 + $0xe0] ss:$8 sps:$4 sm:$0xff]  }
 0x390   :  { %v532_v38 = vadd.f32 %v2429_v31, %v531_v37  ;;  %v543_v41 = vmax.f32 %v529_v5, 0.0  ;;  %v2837_v31 = vld [vmem:[#allocation2 + $0x90] ss:$8 sps:$4 sm:$0xff]   ;;  %v2843_v5 = vld [vmem:[#allocation2 + $0xa0] ss:$8 sps:$4 sm:$0xff]  }
 0x391   :  { %v546_v40 = vmax.f32 %v540_v36, 0.0 }
 0x392   :  { %v544_v42 = vmax.f32 %v532_v38, 0.0  ;;  %v2851_v38 = vld [vmem:[#allocation2 + $0xb4] ss:$8 sps:$4 sm:$0xff]  }
 0x393   :  { %v3203_v43 = vpack.c.bf16 %v546_v40, %v545_v39  ;;  %v2854_v39 = vld [vmem:[#allocation2 + $0xf4] ss:$8 sps:$4 sm:$0xff]  }
 0x394   :  { %v3205_v46 = vpack.c.bf16 %v544_v42, %v543_v41 }
 0x396   :  { %2654 = vmatpush3.bf16.msra.mxu0 %v3205_v46  ;;  %2662 = vmatpush3.bf16.msra.mxu1 %v3205_v46 }
 0x397   :  { %2655 = vmatprep.subr.bf16.mxu0 %v2997_v30  ;;  %2663 = vmatprep.subr.bf16.mxu1 %v2997_v30 }
 0x39a   :  { %2656 = vmatpush3.bf16.msra.mxu0 %v3203_v43  ;;  %2664 = vmatpush3.bf16.msra.mxu1 %v3203_v43 }
 0x39b   :  { %2669 = vmatprep.subr.bf16.mxu0 %v2997_v30  ;;  %2677 = vmatprep.subr.bf16.mxu1 %v2997_v30 }
 0x39d   :  { %2658 = vmatmul.mubr.msk.bf16.vlgmr.msra.gmra.mrb[12].mxu0 %vm77_vm0, %v549_v48  ;;  %2666 = vmatmul.mubr.msk.bf16.vlgmr.msra.gmra.mrb[12].mxu1 %vm77_vm0, %v550_v49  ;;  %v2849_v49 = vld [vmem:[#allocation2 + $0xb0] ss:$8 sps:$4 sm:$0xff]  }
 0x39e   :  { %2670 = vmatpush3.bf16.msra.mxu0 %v3205_v46  ;;  %2678 = vmatpush3.bf16.msra.mxu1 %v3205_v46 }
 0x39f   :  { %2671 = vmatprep.subr.bf16.mxu0 %v2997_v30  ;;  %2679 = vmatprep.subr.bf16.mxu1 %v2997_v30 }
 0x3a0   :  { %2673 = vmatprep.mubr.msk.bf16.mxu0 %vm2998_vm1, %v2997_v30  ;;  %2681 = vmatprep.mubr.msk.bf16.mxu1 %vm2998_vm1, %v2997_v30 }
 0x3a2   :  { %2672 = vmatpush3.bf16.msra.mxu0 %v3203_v43  ;;  %2680 = vmatpush3.bf16.msra.mxu1 %v3203_v43 }
 0x3a3   :  { %2685 = vmatprep.subr.bf16.mxu0 %v2997_v30  ;;  %2693 = vmatprep.subr.bf16.mxu1 %v2997_v30 }
 0x3a5   :  { %2674 = vmatmul.mubr.msk.bf16.vlgmr.msra.gmra.mrb[16].mxu0 %vm77_vm0, %v551_v50  ;;  %2682 = vmatmul.mubr.msk.bf16.vlgmr.msra.gmra.mrb[16].mxu1 %vm77_vm0, %v552_v51  ;;  %v2852_v50 = vld [vmem:[#allocation2 + $0xf0] ss:$8 sps:$4 sm:$0xff]   ;;  %v2857_v51 = vld [vmem:[#allocation2 + $0x104] ss:$8 sps:$4 sm:$0xff]  }
 0x3a6   :  { %2686 = vmatpush3.bf16.msra.mxu0 %v3205_v46  ;;  %2694 = vmatpush3.bf16.msra.mxu1 %v3205_v46 }
 0x3a7   :  { %2687 = vmatprep.subr.bf16.mxu0 %v2997_v30  ;;  %2695 = vmatprep.subr.bf16.mxu1 %v2997_v30 }
 0x3a8   :  { %2689 = vmatprep.mubr.msk.bf16.mxu0 %vm2998_vm1, %v2997_v30  ;;  %2697 = vmatprep.mubr.msk.bf16.mxu1 %vm2998_vm1, %v2997_v30 }
 0x3aa   :  { %2688 = vmatpush3.bf16.msra.mxu0 %v3203_v43  ;;  %2696 = vmatpush3.bf16.msra.mxu1 %v3203_v43 }
 0x3ab   :  { %2701 = vmatprep.subr.bf16.mxu0 %v2997_v30  ;;  %2709 = vmatprep.subr.bf16.mxu1 %v2997_v30 }
 0x3ad   :  { %2690 = vmatmul.mubr.msk.bf16.vlgmr.msra.gmra.mrb[20].mxu0 %vm77_vm0, %v553_v52  ;;  %2698 = vmatmul.mubr.msk.bf16.vlgmr.msra.gmra.mrb[20].mxu1 %vm77_vm0, %v554_v53  ;;  %v2860_v52 = vld [vmem:[#allocation2 + $0x144] ss:$8 sps:$4 sm:$0xff]  }
 0x3ae   :  { %2702 = vmatpush3.bf16.msra.mxu0 %v3205_v46  ;;  %2710 = vmatpush3.bf16.msra.mxu1 %v3205_v46 }
 0x3af   :  { %2703 = vmatprep.subr.bf16.mxu0 %v2997_v30  ;;  %2711 = vmatprep.subr.bf16.mxu1 %v2997_v30 }
 0x3b0   :  { %2705 = vmatprep.mubr.msk.bf16.mxu0 %vm2998_vm1, %v2997_v30  ;;  %2713 = vmatprep.mubr.msk.bf16.mxu1 %vm2998_vm1, %v2997_v30 }
 0x3b2   :  { %2704 = vmatpush3.bf16.msra.mxu0 %v3203_v43  ;;  %2712 = vmatpush3.bf16.msra.mxu1 %v3203_v43 }
 0x3b3   :  { %2717 = vmatprep.subr.bf16.mxu0 %v2997_v30  ;;  %2725 = vmatprep.subr.bf16.mxu1 %v2997_v30 }
 0x3b5   :  { %2706 = vmatmul.mubr.msk.bf16.vlgmr.msra.gmra.mrb[24].mxu0 %vm77_vm0, %v555_v54  ;;  %2714 = vmatmul.mubr.msk.bf16.vlgmr.msra.gmra.mrb[24].mxu1 %vm77_vm0, %v556_v55  ;;  %v2855_v55 = vld [vmem:[#allocation2 + $0x100] ss:$8 sps:$4 sm:$0xff]  }
 0x3b6   :  { %2718 = vmatpush3.bf16.msra.mxu0 %v3205_v46  ;;  %2726 = vmatpush3.bf16.msra.mxu1 %v3205_v46 }
 0x3b7   :  { %2719 = vmatprep.subr.bf16.mxu0 %v2997_v30  ;;  %2727 = vmatprep.subr.bf16.mxu1 %v2997_v30 }
 0x3b8   :  { %2721 = vmatprep.mubr.msk.bf16.mxu0 %vm2998_vm1, %v2997_v30  ;;  %2729 = vmatprep.mubr.msk.bf16.mxu1 %vm2998_vm1, %v2997_v30 }
 0x3ba   :  { %2720 = vmatpush3.bf16.msra.mxu0 %v3203_v43  ;;  %2728 = vmatpush3.bf16.msra.mxu1 %v3203_v43 }
 0x3bb   :  { %2733 = vmatprep.subr.bf16.mxu0 %v2997_v30  ;;  %2741 = vmatprep.subr.bf16.mxu1 %v2997_v30 }
 0x3bd   :  { %2722 = vmatmul.mubr.msk.bf16.vlgmr.msra.gmra.mrb[28].mxu0 %vm77_vm0, %v557_v56  ;;  %2730 = vmatmul.mubr.msk.bf16.vlgmr.msra.gmra.mrb[28].mxu1 %vm77_vm0, %v558_v57  ;;  %v2858_v56 = vld [vmem:[#allocation2 + $0x140] ss:$8 sps:$4 sm:$0xff]  }
 0x3be   :  { %2734 = vmatpush3.bf16.msra.mxu0 %v3205_v46  ;;  %2742 = vmatpush3.bf16.msra.mxu1 %v3205_v46 }
 0x3bf   :  { %2735 = vmatprep.subr.bf16.mxu0 %v2997_v30  ;;  %2743 = vmatprep.subr.bf16.mxu1 %v2997_v30 }
 0x3c0   :  { %2737 = vmatprep.mubr.msk.bf16.mxu0 %vm2998_vm1, %v2997_v30  ;;  %2745 = vmatprep.mubr.msk.bf16.mxu1 %vm2998_vm1, %v2997_v30 }
 0x3c2   :  { %2736 = vmatpush3.bf16.msra.mxu0 %v3203_v43  ;;  %2744 = vmatpush3.bf16.msra.mxu1 %v3203_v43 }
 0x3c3   :  { %2749 = vmatprep.subr.bf16.mxu0 %v2997_v30  ;;  %1282 = vmatprep.subr.bf16.mxu1 %v2809_v58 }
 0x3c5   :  { %2738 = vmatmul.mubr.msk.bf16.vlgmr.msra.gmra.mrb[32].mxu0 %vm77_vm0, %v559_v59  ;;  %2746 = vmatmul.mubr.msk.bf16.vlgmr.msra.gmra.mrb[32].mxu1 %vm77_vm0, %v560_v60  ;;  %v2863_v59 = vld [vmem:[#allocation2 + $0x114] ss:$8 sps:$4 sm:$0xff]  }
 0x3c6   :  { %2750 = vmatpush3.bf16.msra.mxu0 %v3205_v46  ;;  %2753 = vmatprep.mubr.msk.bf16.mxu0 %vm2998_vm1, %v2997_v30  ;;  %v2866_v60 = vld [vmem:[#allocation2 + $0x154] ss:$8 sps:$4 sm:$0xff]  }
 0x3c7   :  { %2751 = vmatprep.subr.bf16.mxu0 %v2997_v30  ;;  %1283 = vmatpush1.bf16.msra.mxu1 %v2807_v61 }
 0x3c8   :  { %1284 = vmatprep.subr.bf16.mxu1 %v2815_v62  ;;  %1314 = vmatprep.mubr.bf16.mxu1 %v2996_v20 }
 0x3ca   :  { %2752 = vmatpush3.bf16.msra.mxu0 %v3203_v43 }
 0x3cb   :  { %1366 = vmatprep.subr.bf16.mxu0 %v2812_v63  ;;  %1285 = vmatpush1.bf16.msra.mxu1 %v2813_v0 }
 0x3cc   :  { %1286 = vmatprep.subr.bf16.mxu1 %v2821_v1 }
 0x3cd   :  { %2754 = vmatmul.mubr.msk.bf16.vlgmr.msra.gmra.mrb[36].mxu0 %vm77_vm0, %v561_v2 }
 0x3ce   :  { %1367 = vmatpush1.bf16.msra.mxu0 %v2810_v3  ;;  %1398 = vmatprep.mubr.bf16.mxu0 %v2996_v20  ;;  %v2861_v3 = vld [vmem:[#allocation2 + $0x110] ss:$8 sps:$4 sm:$0xff]  }
 0x3cf   :  { %1368 = vmatprep.subr.bf16.mxu0 %v2818_v4  ;;  %1287 = vmatpush1.bf16.msra.mxu1 %v2819_v6  ;;  %v2864_v4 = vld [vmem:[#allocation2 + $0x150] ss:$8 sps:$4 sm:$0xff]   ;;  %v2869_v6 = vld [vmem:[#allocation2 + $0x124] ss:$8 sps:$4 sm:$0xff]  }
 0x3d0   :  { %1288 = vmatprep.subr.bf16.mxu1 %v2827_v7  ;;  %v2872_v7 = vld [vmem:[#allocation2 + $0x164] ss:$8 sps:$4 sm:$0xff]  }
 0x3d2   :  { %1369 = vmatpush1.bf16.msra.mxu0 %v2816_v8  ;;  %v2867_v8 = vld [vmem:[#allocation2 + $0x120] ss:$8 sps:$4 sm:$0xff]  }
 0x3d3   :  { %1370 = vmatprep.subr.bf16.mxu0 %v2824_v9  ;;  %1289 = vmatpush1.bf16.msra.mxu1 %v2825_v10  ;;  %v2870_v9 = vld [vmem:[#allocation2 + $0x160] ss:$8 sps:$4 sm:$0xff]  }
 0x3d4   :  { %1450 = vmatprep.subr.bf16.mxu1 %v2833_v14 }
 0x3d6   :  { %1371 = vmatpush1.bf16.msra.mxu0 %v2822_v11 }
 0x3d7   :  { %1372 = vmatprep.subr.bf16.mxu0 %v2830_v12  ;;  %v2875_v12 = vld [vmem:[#allocation2 + $0x134] ss:$8 sps:$4 sm:$0xff]  }
 0x3da   :  { %1373 = vmatpush1.bf16.msra.mxu0 %v2828_v13  ;;  %v2878_v13 = vld [vmem:[#allocation2 + $0x174] ss:$8 sps:$4 sm:$0xff]  }
 0x3db   :  { %1534 = vmatprep.subr.bf16.mxu0 %v2836_v15 }
 0x470   :  { %v599_v17 = vpop.f32.mrb[12].mxu0  ;;  %v642_v18 = vpop.f32.mrb[12].mxu1 }
 0x471   :  { %v1121_v21 = vpack.c.bf16 %v599_v17, %v599_v17  ;;  %v1122_v22 = vpack.c.bf16 %v642_v18, %v642_v18  ;;  %v2659_v24 = vpop.f32.mrb[13].mxu0  ;;  %v2667_v26 = vpop.f32.mrb[13].mxu1 }
 0x472   :  { %v602_v27 = vpop.f32.mrb[14].mxu0  ;;  %v645_v28 = vpop.f32.mrb[14].mxu1  ;;  %v2884_v24 = vld [vmem:[#allocation2 + $0x1c4] ss:$8 sps:$4 sm:$0xff]  }
 0x473   :  { %2453 = vmatmul.mubr.msk.bf16.vlgmr.msra.gmra.mrb[36].mxu1 %vm1278_vm2, %v1121_v21  ;;  %2462 = vmatmul.mubr.msk.bf16.vlgmr.msra.gmra.mrb[40].mxu0 %vm1278_vm2, %v1122_v22  ;;  %v2660_v29 = vpop.f32.mrb[15].mxu0  ;;  %v2668_v30 = vpop.f32.mrb[15].mxu1  ;;  %v2873_v21 = vld [vmem:[#allocation2 + $0x130] ss:$8 sps:$4 sm:$0xff]   ;;  %v2879_v27 = vld [vmem:[#allocation2 + $0x180] ss:$8 sps:$4 sm:$0xff]  }
 0x474   :  { %1451 = vmatpush1.bf16.msra.mxu1 %v2831_v16  ;;  %1535 = vmatpush1.bf16.msra.mxu0 %v2834_v19  ;;  %v2876_v22 = vld [vmem:[#allocation2 + $0x170] ss:$8 sps:$4 sm:$0xff]   ;;  %v2882_v28 = vld [vmem:[#allocation2 + $0x1c0] ss:$8 sps:$4 sm:$0xff]  }
 0x475   :  { %1452 = vmatprep.subr.bf16.mxu1 %v2839_v23  ;;  %1536 = vmatprep.subr.bf16.mxu0 %v2842_v25  ;;  %v2881_v23 = vld [vmem:[#allocation2 + $0x184] ss:$8 sps:$4 sm:$0xff]  }
 0x476   :  { %1482 = vmatprep.mubr.bf16.mxu1 %v2996_v20  ;;  %1566 = vmatprep.mubr.bf16.mxu0 %v2996_v20 }
 0x478   :  { %1453 = vmatpush1.bf16.msra.mxu1 %v2837_v31  ;;  %1537 = vmatpush1.bf16.msra.mxu0 %v2840_v32  ;;  %v685_v36 = vpop.f32.mrb[16].mxu0  ;;  %v728_v37 = vpop.f32.mrb[16].mxu1  ;;  %v2887_v31 = vld [vmem:[#allocation2 + $0x194] ss:$8 sps:$4 sm:$0xff]  }
 0x479   :  { %1454 = vmatprep.subr.bf16.mxu1 %v2845_v33  ;;  %1538 = vmatprep.subr.bf16.mxu0 %v2848_v34  ;;  %v2675_v40 = vpop.f32.mrb[17].mxu0  ;;  %v2683_v41 = vpop.f32.mrb[17].mxu1  ;;  %v1123_v53 = vpack.c.bf16 %v685_v36, %v685_v36  ;;  %v1124_v54 = vpack.c.bf16 %v728_v37, %v728_v37  ;;  %v2890_v32 = vld [vmem:[#allocation2 + $0x1d4] ss:$8 sps:$4 sm:$0xff]  }
 0x47a   :  { %v688_v42 = vpop.f32.mrb[18].mxu0  ;;  %v731_v43 = vpop.f32.mrb[18].mxu1  ;;  %v2893_v40 = vld [vmem:[#allocation2 + $0x1a4] ss:$8 sps:$4 sm:$0xff]  }
 0x47b   :  { %v2676_v46 = vpop.f32.mrb[19].mxu0  ;;  %v2684_v48 = vpop.f32.mrb[19].mxu1  ;;  %v2896_v41 = vld [vmem:[#allocation2 + $0x1e4] ss:$8 sps:$4 sm:$0xff]   ;;  %v2891_v42 = vld [vmem:[#allocation2 + $0x1a0] ss:$8 sps:$4 sm:$0xff]  }
 0x47c   :  { %1455 = vmatpush1.bf16.msra.mxu1 %v2843_v5  ;;  %1539 = vmatpush1.bf16.msra.mxu0 %v2846_v35  ;;  %v2894_v43 = vld [vmem:[#allocation2 + $0x1e0] ss:$8 sps:$4 sm:$0xff]  }
 0x47d   :  { %1456 = vmatprep.subr.bf16.mxu1 %v2851_v38  ;;  %1540 = vmatprep.subr.bf16.mxu0 %v2854_v39  ;;  %v2885_v38 = vld [vmem:[#allocation2 + $0x190] ss:$8 sps:$4 sm:$0xff]  }
 0x47e   :  { %v2888_v39 = vld [vmem:[#allocation2 + $0x1d0] ss:$8 sps:$4 sm:$0xff]  }
 0x480   :  { %1457 = vmatpush1.bf16.msra.mxu1 %v2849_v49  ;;  %1541 = vmatpush1.bf16.msra.mxu0 %v2852_v50  ;;  %v3337_v57 = vpop.f32.mrb[20].mxu0  ;;  %v3339_v58 = vpop.f32.mrb[20].mxu1  ;;  %v2899_v49 = vld [vmem:[#allocation2 + $0x1b4] ss:$8 sps:$4 sm:$0xff]  }
 0x481   :  { %1618 = vmatprep.subr.bf16.mxu1 %v2857_v51  ;;  %1702 = vmatprep.subr.bf16.mxu0 %v2860_v52  ;;  %v2691_v61 = vpop.f32.mrb[21].mxu0  ;;  %v2699_v62 = vpop.f32.mrb[21].mxu1  ;;  %v1125_v25 = vpack.c.bf16 %v3337_v57, %v3337_v57  ;;  %v1126_v26 = vpack.c.bf16 %v3339_v58, %v3339_v58  ;;  %v2902_v50 = vld [vmem:[#allocation2 + $0x1f4] ss:$8 sps:$4 sm:$0xff]   ;;  %v2897_v57 = vld [vmem:[#allocation2 + $0x1b0] ss:$8 sps:$4 sm:$0xff]  }
 0x482   :  { %v774_v63 = vpop.f32.mrb[22].mxu0  ;;  %v817_v0 = vpop.f32.mrb[22].mxu1  ;;  %v2900_v58 = vld [vmem:[#allocation2 + $0x1f0] ss:$8 sps:$4 sm:$0xff]  }
 0x483   :  { %2471 = vmatmul.mubr.msk.bf16.vlgmr.msra.gmra.mrb[40].mxu1 %vm1278_vm2, %v1123_v53  ;;  %2480 = vmatmul.mubr.msk.bf16.vlgmr.msra.gmra.mrb[44].mxu0 %vm1278_vm2, %v1124_v54  ;;  %v2692_v1 = vpop.f32.mrb[23].mxu0  ;;  %v2700_v2 = vpop.f32.mrb[23].mxu1  ;;  %v2903_v63 = vld [vmem:[#allocation2 + $0x200] ss:$8 sps:$4 sm:$0xff]  }
 0x484   :  { %1619 = vmatpush1.bf16.msra.mxu1 %v2855_v55  ;;  %1703 = vmatpush1.bf16.msra.mxu0 %v2858_v56  ;;  %v2906_v0 = vld [vmem:[#allocation2 + $0x240] ss:$8 sps:$4 sm:$0xff]   ;;  %v2911_v2 = vld [vmem:[#allocation2 + $0x214] ss:$8 sps:$4 sm:$0xff]  }
 0x485   :  { %1620 = vmatprep.subr.bf16.mxu1 %v2863_v59  ;;  %1704 = vmatprep.subr.bf16.mxu0 %v2866_v60  ;;  %v2905_v59 = vld [vmem:[#allocation2 + $0x204] ss:$8 sps:$4 sm:$0xff]  }
 0x486   :  { %1650 = vmatprep.mubr.bf16.mxu1 %v2996_v20  ;;  %1734 = vmatprep.mubr.bf16.mxu0 %v2996_v20  ;;  %v2908_v60 = vld [vmem:[#allocation2 + $0x244] ss:$8 sps:$4 sm:$0xff]  }
 0x488   :  { %1621 = vmatpush1.bf16.msra.mxu1 %v2861_v3  ;;  %1705 = vmatpush1.bf16.msra.mxu0 %v2864_v4  ;;  %v3345_v10 = vpop.f32.mrb[24].mxu0  ;;  %v3347_v11 = vpop.f32.mrb[24].mxu1  ;;  %v2914_v3 = vld [vmem:[#allocation2 + $0x254] ss:$8 sps:$4 sm:$0xff]  }
 0x489   :  { %1622 = vmatprep.subr.bf16.mxu1 %v2869_v6  ;;  %1706 = vmatprep.subr.bf16.mxu0 %v2872_v7  ;;  %v2707_v14 = vpop.f32.mrb[25].mxu0  ;;  %v2715_v15 = vpop.f32.mrb[25].mxu1  ;;  %v1127_v61 = vpack.c.bf16 %v3345_v10, %v3345_v10  ;;  %v1128_v62 = vpack.c.bf16 %v3347_v11, %v3347_v11  ;;  %v2917_v10 = vld [vmem:[#allocation2 + $0x224] ss:$8 sps:$4 sm:$0xff]  }
 0x48a   :  { %v860_v16 = vpop.f32.mrb[26].mxu0  ;;  %v903_v17 = vpop.f32.mrb[26].mxu1  ;;  %v2920_v11 = vld [vmem:[#allocation2 + $0x264] ss:$8 sps:$4 sm:$0xff]   ;;  %v2923_v14 = vld [vmem:[#allocation2 + $0x234] ss:$8 sps:$4 sm:$0xff]  }
 0x48b   :  { %v2708_v18 = vpop.f32.mrb[27].mxu0  ;;  %v2716_v19 = vpop.f32.mrb[27].mxu1  ;;  %v2926_v15 = vld [vmem:[#allocation2 + $0x274] ss:$8 sps:$4 sm:$0xff]   ;;  %v2921_v16 = vld [vmem:[#allocation2 + $0x230] ss:$8 sps:$4 sm:$0xff]  }
 0x48c   :  { %1623 = vmatpush1.bf16.msra.mxu1 %v2867_v8  ;;  %1707 = vmatpush1.bf16.msra.mxu0 %v2870_v9  ;;  %v2909_v8 = vld [vmem:[#allocation2 + $0x210] ss:$8 sps:$4 sm:$0xff]   ;;  %v2929_v18 = vld [vmem:[#allocation2 + $0x284] ss:$8 sps:$4 sm:$0xff]  }
 0x48d   :  { %1624 = vmatprep.subr.bf16.mxu1 %v2875_v12  ;;  %1708 = vmatprep.subr.bf16.mxu0 %v2878_v13  ;;  %v2912_v9 = vld [vmem:[#allocation2 + $0x250] ss:$8 sps:$4 sm:$0xff]   ;;  %v2915_v12 = vld [vmem:[#allocation2 + $0x220] ss:$8 sps:$4 sm:$0xff]   ;;  %v2932_v19 = vld [vmem:[#allocation2 + $0x2c4] ss:$8 sps:$4 sm:$0xff]  }
 0x48e   :  { %v2918_v13 = vld [vmem:[#allocation2 + $0x260] ss:$8 sps:$4 sm:$0xff]   ;;  %v2924_v17 = vld [vmem:[#allocation2 + $0x270] ss:$8 sps:$4 sm:$0xff]  }
 0x490   :  { %1625 = vmatpush1.bf16.msra.mxu1 %v2873_v21  ;;  %1709 = vmatpush1.bf16.msra.mxu0 %v2876_v22  ;;  %v3353_v29 = vpop.f32.mrb[28].mxu0  ;;  %v3355_v30 = vpop.f32.mrb[28].mxu1 }
 0x491   :  { %1786 = vmatprep.subr.bf16.mxu1 %v2881_v23  ;;  %1870 = vmatprep.subr.bf16.mxu0 %v2884_v24  ;;  %v2723_v33 = vpop.f32.mrb[29].mxu0  ;;  %v2731_v34 = vpop.f32.mrb[29].mxu1  ;;  %v1129_v21 = vpack.c.bf16 %v3353_v29, %v3353_v29  ;;  %v1130_v22 = vpack.c.bf16 %v3355_v30, %v3355_v30  ;;  %v2927_v23 = vld [vmem:[#allocation2 + $0x280] ss:$8 sps:$4 sm:$0xff]   ;;  %v2941_v29 = vld [vmem:[#allocation2 + $0x2a4] ss:$8 sps:$4 sm:$0xff]  }
 0x492   :  { %v946_v5 = vpop.f32.mrb[30].mxu0  ;;  %v989_v35 = vpop.f32.mrb[30].mxu1  ;;  %v2930_v24 = vld [vmem:[#allocation2 + $0x2c0] ss:$8 sps:$4 sm:$0xff]   ;;  %v2944_v30 = vld [vmem:[#allocation2 + $0x2e4] ss:$8 sps:$4 sm:$0xff]  }
 0x493   :  { %2489 = vmatmul.mubr.msk.bf16.vlgmr.msra.gmra.mrb[44].mxu1 %vm1278_vm2, %v1125_v25  ;;  %2498 = vmatmul.mubr.msk.bf16.vlgmr.msra.gmra.mrb[48].mxu0 %vm1278_vm2, %v1126_v26  ;;  %v2724_v36 = vpop.f32.mrb[31].mxu0  ;;  %v2732_v37 = vpop.f32.mrb[31].mxu1  ;;  %v2935_v25 = vld [vmem:[#allocation2 + $0x294] ss:$8 sps:$4 sm:$0xff]   ;;  %v2945_v5 = vld [vmem:[#allocation2 + $0x2b0] ss:$8 sps:$4 sm:$0xff]  }
 0x494   :  { %1787 = vmatpush1.bf16.msra.mxu1 %v2879_v27  ;;  %1871 = vmatpush1.bf16.msra.mxu0 %v2882_v28  ;;  %v2938_v26 = vld [vmem:[#allocation2 + $0x2d4] ss:$8 sps:$4 sm:$0xff]   ;;  %v2933_v27 = vld [vmem:[#allocation2 + $0x290] ss:$8 sps:$4 sm:$0xff]   ;;  %v2953_v36 = vld [vmem:[#allocation2 + $0x304] ss:$8 sps:$4 sm:$0xff]  }
 0x495   :  { %1788 = vmatprep.subr.bf16.mxu1 %v2887_v31  ;;  %1872 = vmatprep.subr.bf16.mxu0 %v2890_v32  ;;  %v2936_v28 = vld [vmem:[#allocation2 + $0x2d0] ss:$8 sps:$4 sm:$0xff]   ;;  %v2939_v31 = vld [vmem:[#allocation2 + $0x2a0] ss:$8 sps:$4 sm:$0xff]   ;;  %v2947_v33 = vld [vmem:[#allocation2 + $0x2b4] ss:$8 sps:$4 sm:$0xff]  }
 0x496   :  { %1818 = vmatprep.mubr.bf16.mxu1 %v2996_v20  ;;  %1902 = vmatprep.mubr.bf16.mxu0 %v2996_v20  ;;  %v2942_v32 = vld [vmem:[#allocation2 + $0x2e0] ss:$8 sps:$4 sm:$0xff]   ;;  %v2950_v34 = vld [vmem:[#allocation2 + $0x2f4] ss:$8 sps:$4 sm:$0xff]   ;;  %v2948_v35 = vld [vmem:[#allocation2 + $0x2f0] ss:$8 sps:$4 sm:$0xff]  }
 0x498   :  { %1789 = vmatpush1.bf16.msra.mxu1 %v2885_v38  ;;  %1873 = vmatpush1.bf16.msra.mxu0 %v2888_v39  ;;  %v3361_v46 = vpop.f32.mrb[32].mxu0  ;;  %v3363_v48 = vpop.f32.mrb[32].mxu1  ;;  %v2951_v39 = vld [vmem:[#allocation2 + $0x300] ss:$8 sps:$4 sm:$0xff]  }
 0x499   :  { %1790 = vmatprep.subr.bf16.mxu1 %v2893_v40  ;;  %1874 = vmatprep.subr.bf16.mxu0 %v2896_v41  ;;  %v2739_v51 = vpop.f32.mrb[33].mxu0  ;;  %v2747_v52 = vpop.f32.mrb[33].mxu1  ;;  %v1131_v37 = vpack.c.bf16 %v3361_v46, %v3361_v46  ;;  %v1132_v38 = vpack.c.bf16 %v3363_v48, %v3363_v48  ;;  %v2956_v40 = vld [vmem:[#allocation2 + $0x314] ss:$8 sps:$4 sm:$0xff]   ;;  %v2954_v41 = vld [vmem:[#allocation2 + $0x310] ss:$8 sps:$4 sm:$0xff]  }
 0x49a   :  { %v1032_v53 = vpop.f32.mrb[34].mxu0  ;;  %v1075_v54 = vpop.f32.mrb[34].mxu1  ;;  %v2962_v46 = vld [vmem:[#allocation2 + $0x334] ss:$8 sps:$4 sm:$0xff]   ;;  %v2960_v48 = vld [vmem:[#allocation2 + $0x330] ss:$8 sps:$4 sm:$0xff]  }
 0x49b   :  { %v2740_v55 = vpop.f32.mrb[35].mxu0  ;;  %v2748_v56 = vpop.f32.mrb[35].mxu1 }
 0x49c   :  { %1791 = vmatpush1.bf16.msra.mxu1 %v2891_v42  ;;  %1875 = vmatpush1.bf16.msra.mxu0 %v2894_v43  ;;  %v2959_v42 = vld [vmem:[#allocation2 + $0x324] ss:$8 sps:$4 sm:$0xff]   ;;  %v2957_v43 = vld [vmem:[#allocation2 + $0x320] ss:$8 sps:$4 sm:$0xff]  }
 0x49d   :  { %1792 = vmatprep.subr.bf16.mxu1 %v2899_v49  ;;  %1876 = vmatprep.subr.bf16.mxu0 %v2902_v50 }
 0x4a0   :  { %1793 = vmatpush1.bf16.msra.mxu1 %v2897_v57  ;;  %1877 = vmatpush1.bf16.msra.mxu0 %v2900_v58  ;;  %v3369_v1 = vpop.f32.mrb[36].mxu0 }
 0x4a1   :  { %1954 = vmatprep.subr.bf16.mxu1 %v2905_v59  ;;  %2038 = vmatprep.subr.bf16.mxu0 %v2908_v60  ;;  %v2755_v4 = vpop.f32.mrb[37].mxu0  ;;  %v1133_v49 = vpack.c.bf16 %v3369_v1, %v3369_v1 }
 0x4a2   :  { %v1118_v6 = vpop.f32.mrb[38].mxu0 }
 0x4a3   :  { %2507 = vmatmul.mubr.msk.bf16.vlgmr.msra.gmra.mrb[48].mxu1 %vm1278_vm2, %v1127_v61  ;;  %2516 = vmatmul.mubr.msk.bf16.vlgmr.msra.gmra.mrb[52].mxu0 %vm1278_vm2, %v1128_v62  ;;  %v2756_v7 = vpop.f32.mrb[39].mxu0 }
 0x4a4   :  { %1955 = vmatpush1.bf16.msra.mxu1 %v2903_v63  ;;  %2039 = vmatpush1.bf16.msra.mxu0 %v2906_v0 }
 0x4a5   :  { %1956 = vmatprep.subr.bf16.mxu1 %v2911_v2  ;;  %2040 = vmatprep.subr.bf16.mxu0 %v2914_v3 }
 0x4a6   :  { %1986 = vmatprep.mubr.bf16.mxu1 %v2996_v20  ;;  %2070 = vmatprep.mubr.bf16.mxu0 %v2996_v20 }
 0x4a8   :  { %1957 = vmatpush1.bf16.msra.mxu1 %v2909_v8  ;;  %2041 = vmatpush1.bf16.msra.mxu0 %v2912_v9 }
 0x4a9   :  { %1958 = vmatprep.subr.bf16.mxu1 %v2917_v10  ;;  %2042 = vmatprep.subr.bf16.mxu0 %v2920_v11 }
 0x4ac   :  { %1959 = vmatpush1.bf16.msra.mxu1 %v2915_v12  ;;  %2043 = vmatpush1.bf16.msra.mxu0 %v2918_v13 }
 0x4ad   :  { %1960 = vmatprep.subr.bf16.mxu1 %v2923_v14  ;;  %2044 = vmatprep.subr.bf16.mxu0 %v2926_v15 }
 0x4b0   :  { %1961 = vmatpush1.bf16.msra.mxu1 %v2921_v16  ;;  %2045 = vmatpush1.bf16.msra.mxu0 %v2924_v17 }
 0x4b1   :  { %2122 = vmatprep.subr.bf16.mxu1 %v2929_v18  ;;  %2206 = vmatprep.subr.bf16.mxu0 %v2932_v19 }
 0x4b3   :  { %2525 = vmatmul.mubr.msk.bf16.vlgmr.msra.gmra.mrb[52].mxu1 %vm1278_vm2, %v1129_v21  ;;  %2534 = vmatmul.mubr.msk.bf16.vlgmr.msra.gmra.mrb[56].mxu0 %vm1278_vm2, %v1130_v22 }
 0x4b4   :  { %2123 = vmatpush1.bf16.msra.mxu1 %v2927_v23  ;;  %2207 = vmatpush1.bf16.msra.mxu0 %v2930_v24 }
 0x4b5   :  { %2124 = vmatprep.subr.bf16.mxu1 %v2935_v25  ;;  %2208 = vmatprep.subr.bf16.mxu0 %v2938_v26 }
 0x4b6   :  { %2154 = vmatprep.mubr.bf16.mxu1 %v2996_v20  ;;  %2238 = vmatprep.mubr.bf16.mxu0 %v2996_v20 }
 0x4b8   :  { %2125 = vmatpush1.bf16.msra.mxu1 %v2933_v27  ;;  %2209 = vmatpush1.bf16.msra.mxu0 %v2936_v28 }
 0x4b9   :  { %2126 = vmatprep.subr.bf16.mxu1 %v2941_v29  ;;  %2210 = vmatprep.subr.bf16.mxu0 %v2944_v30 }
 0x4bc   :  { %2127 = vmatpush1.bf16.msra.mxu1 %v2939_v31  ;;  %2211 = vmatpush1.bf16.msra.mxu0 %v2942_v32 }
 0x4bd   :  { %2128 = vmatprep.subr.bf16.mxu1 %v2947_v33  ;;  %2212 = vmatprep.subr.bf16.mxu0 %v2950_v34 }
 0x4c0   :  { %2129 = vmatpush1.bf16.msra.mxu1 %v2945_v5  ;;  %2213 = vmatpush1.bf16.msra.mxu0 %v2948_v35 }
 0x4c1   :  { %2290 = vmatprep.subr.bf16.mxu1 %v2953_v36 }
 0x4c3   :  { %2543 = vmatmul.mubr.msk.bf16.vlgmr.msra.gmra.mrb[56].mxu1 %vm1278_vm2, %v1131_v37  ;;  %2552 = vmatmul.mubr.msk.bf16.vlgmr.msra.gmra.mrb[60].mxu0 %vm1278_vm2, %v1132_v38 }
 0x4c4   :  { %2291 = vmatpush1.bf16.msra.mxu1 %v2951_v39  ;;  %2322 = vmatprep.mubr.bf16.mxu1 %v2996_v20 }
 0x4c5   :  { %2292 = vmatprep.subr.bf16.mxu1 %v2956_v40 }
 0x4c8   :  { %2293 = vmatpush1.bf16.msra.mxu1 %v2954_v41 }
 0x4c9   :  { %2294 = vmatprep.subr.bf16.mxu1 %v2959_v42 }
 0x4cc   :  { %2295 = vmatpush1.bf16.msra.mxu1 %v2957_v43 }
 0x4cd   :  { %2296 = vmatprep.subr.bf16.mxu1 %v2962_v46 }
 0x4d0   :  { %2297 = vmatpush1.bf16.msra.mxu1 %v2960_v48 }
 0x4d3   :  { %2561 = vmatmul.mubr.msk.bf16.vlgmr.msra.gmra.mrb[60].mxu1 %vm1278_vm2, %v1133_v49 }
 0x546   :  { %v1316_v50 = vpop.f32.mrb[36].mxu1  ;;  %v1400_v51 = vpop.f32.mrb[40].mxu0 }
 0x547   :  { %v1318_v52 = vpop.f32.mrb[37].mxu1  ;;  %v2331_v53 = vadd.f32 %v1400_v51, %v1316_v50  ;;  %v1402_v20 = vpop.f32.mrb[41].mxu0 }
 0x548   :  { %v1320_v54 = vpop.f32.mrb[38].mxu1  ;;  %v2343_v55 = vadd.f32 %v1402_v20, %v1318_v52  ;;  %v1404_v56 = vpop.f32.mrb[42].mxu0 }
 0x549   :  { %v1321_v57 = vpop.f32.mrb[39].mxu1  ;;  %v1405_v58 = vpop.f32.mrb[43].mxu0 }
 0x54a   :  { %v2355_v58 = vld [vmem:[%s3414_s8] sm:$0x3] }
 0x556   :  { %v1484_v59 = vpop.f32.mrb[40].mxu1  ;;  %v1568_v60 = vpop.f32.mrb[44].mxu0 }
 0x557   :  { %v2332_v61 = vadd.f32 %v2331_v53, %v1484_v59  ;;  %v1486_v62 = vpop.f32.mrb[41].mxu1  ;;  %v1570_v63 = vpop.f32.mrb[45].mxu0  ;;  %v2360_v59 = vrot.slane %v2355_v58, %v155_v45 }
 0x558   :  { %v2344_v0 = vadd.f32 %v2343_v55, %v1486_v62  ;;  %v1488_v1 = vpop.f32.mrb[42].mxu1  ;;  %v1572_v2 = vpop.f32.mrb[46].mxu0 }
 0x559   :  { %v2333_v3 = vadd.f32 %v2332_v61, %v1568_v60  ;;  %v1489_v4 = vpop.f32.mrb[43].mxu1  ;;  %v1573_v6 = vpop.f32.mrb[47].mxu0  ;;  %v2364_v61 = vrot.slane %v2355_v58, %v159_v47 }
 0x55a   :  { %v2345_v7 = vadd.f32 %v2344_v0, %v1570_v63 }
 0x566   :  { %v1652_v8 = vpop.f32.mrb[44].mxu1  ;;  %v1736_v9 = vpop.f32.mrb[48].mxu0 }
 0x567   :  { %v2334_v10 = vadd.f32 %v2333_v3, %v1652_v8  ;;  %v1654_v11 = vpop.f32.mrb[45].mxu1  ;;  %v1738_v12 = vpop.f32.mrb[49].mxu0 }
 0x568   :  { %v2346_v13 = vadd.f32 %v2345_v7, %v1654_v11  ;;  %v1656_v14 = vpop.f32.mrb[46].mxu1  ;;  %v1740_v15 = vpop.f32.mrb[50].mxu0 }
 0x569   :  { %v2335_v16 = vadd.f32 %v2334_v10, %v1736_v9  ;;  %v1657_v17 = vpop.f32.mrb[47].mxu1  ;;  %v1741_v18 = vpop.f32.mrb[51].mxu0 }
 0x56a   :  { %v2347_v19 = vadd.f32 %v2346_v13, %v1738_v12 }
 0x576   :  { %v1820_v21 = vpop.f32.mrb[48].mxu1  ;;  %v1904_v22 = vpop.f32.mrb[52].mxu0 }
 0x577   :  { %v2336_v23 = vadd.f32 %v2335_v16, %v1820_v21  ;;  %v1822_v24 = vpop.f32.mrb[49].mxu1  ;;  %v1906_v25 = vpop.f32.mrb[53].mxu0 }
 0x578   :  { %v2348_v26 = vadd.f32 %v2347_v19, %v1822_v24  ;;  %v1824_v27 = vpop.f32.mrb[50].mxu1  ;;  %v1908_v28 = vpop.f32.mrb[54].mxu0 }
 0x579   :  { %v2337_v29 = vadd.f32 %v2336_v23, %v1904_v22  ;;  %v1825_v30 = vpop.f32.mrb[51].mxu1  ;;  %v1909_v31 = vpop.f32.mrb[55].mxu0 }
 0x57a   :  { %v2349_v32 = vadd.f32 %v2348_v26, %v1906_v25 }
 0x586   :  { %v1988_v33 = vpop.f32.mrb[52].mxu1  ;;  %v2072_v34 = vpop.f32.mrb[56].mxu0 }
 0x587   :  { %v2338_v5 = vadd.f32 %v2337_v29, %v1988_v33  ;;  %v1990_v35 = vpop.f32.mrb[53].mxu1  ;;  %v2074_v36 = vpop.f32.mrb[57].mxu0 }
 0x588   :  { %v2350_v37 = vadd.f32 %v2349_v32, %v1990_v35  ;;  %v1992_v38 = vpop.f32.mrb[54].mxu1  ;;  %v2076_v39 = vpop.f32.mrb[58].mxu0 }
 0x589   :  { %v2339_v40 = vadd.f32 %v2338_v5, %v2072_v34  ;;  %v1993_v41 = vpop.f32.mrb[55].mxu1  ;;  %v2077_v42 = vpop.f32.mrb[59].mxu0 }
 0x58a   :  { %v2351_v43 = vadd.f32 %v2350_v37, %v2074_v36 }
 0x596   :  { %v2156_v46 = vpop.f32.mrb[56].mxu1  ;;  %v2240_v48 = vpop.f32.mrb[60].mxu0 }
 0x597   :  { %v2340_v49 = vadd.f32 %v2339_v40, %v2156_v46  ;;  %v2158_v50 = vpop.f32.mrb[57].mxu1  ;;  %v2242_v51 = vpop.f32.mrb[61].mxu0 }
 0x598   :  { %v2352_v52 = vadd.f32 %v2351_v43, %v2158_v50  ;;  %v2160_v53 = vpop.f32.mrb[58].mxu1  ;;  %v2244_v20 = vpop.f32.mrb[62].mxu0 }
 0x599   :  { %v2341_v54 = vadd.f32 %v2340_v49, %v2240_v48  ;;  %v2161_v55 = vpop.f32.mrb[59].mxu1  ;;  %v2245_v56 = vpop.f32.mrb[63].mxu0 }
 0x59a   :  { %v2353_v57 = vadd.f32 %v2352_v52, %v2242_v51 }
 0x5a6   :  { %v2324_v60 = vpop.f32.mrb[60].mxu1 }
 0x5a7   :  { %v2342_v62 = vadd.f32 %v2341_v54, %v2324_v60  ;;  %v2326_v63 = vpop.f32.mrb[61].mxu1 }
 0x5a8   :  { %v2354_v0 = vadd.f32 %v2353_v57, %v2326_v63  ;;  %v2328_v1 = vpop.f32.mrb[62].mxu1 }
 0x5a9   :  { %v2367_v2 = vadd.f32 %v2360_v59, %v2342_v62  ;;  %v2329_v3 = vpop.f32.mrb[63].mxu1 }
 0x5aa   :  { %v2368_v4 = vadd.f32 %v2364_v61, %v2354_v0 }
 0x5ac   :  { %v2369_v6 = vmax.f32 %v2367_v2, %v2368_v4 }
 0x5ae   :  { %2370 = vmax.xlane.f32.xlu0 %v2369_v6 }
 0x63b   :  { %v2371_v7 = vpop.xlane.xlu0 %2370 }
 0x63c   :  { %v2372_v8 = vsub.f32 %v2367_v2, %v2371_v7  ;;  %v2373_v9 = vsub.f32 %v2368_v4, %v2371_v7 }
 0x63e   :  { %v2374_v10 = vmul.f32 1.442695, %v2372_v8  ;;  %v2376_v11 = vmul.f32 1.442695, %v2373_v9 }
 0x640   :  { %2963 = vpow2.f32 %v2374_v10 }
 0x641   :  { %2965 = vpow2.f32 %v2376_v11 }
 0x64a   :  { %v2964_v45 = vpop.eup %2963 }
 0x64b   :  { %v2966_v12 = vpop.eup %2965 }
 0x64c   :  { %v2378_v44 = vadd.f32 %v2966_v12, %v2964_v45 }
 0x64e   :  { %2379 = vadd.xlane.f32.xlu0 %v2378_v44 }
 0x6db   :  { %v2380_v47 = vpop.xlane.xlu0 %2379 }
 0x6dc   :  { %2967 = vrcp.f32 %v2380_v47 }
 0x6e6   :  { %v2968_v13 = vpop.eup %2967 }
 0x6e7   :  { %v2382_v14 = vmul.f32 %v2968_v13, %v2964_v45  ;;  %v2383_v15 = vmul.f32 %v2968_v13, %v2966_v12 }
 0x6e9   :  { %2384 = vst [vmem:[%s3415_s9] sm:$0xff] %v2382_v14  ;;  %2385 = vst [vmem:[%s3415_s9 + $0x8] sm:$0xff] %v2383_v15 }
 0x6ea   :  { %2390 = vsyncpa [#allocation3], 1 }

</bundles_post_ra>
